<compile_context>
chip_gen: v7x
topology: tpu7x:2x2x1
jax: 0.10.0
libtpu: 0.0.40
codegen_flags: <defaults>
</compile_context>

<pallas_src>
import jax
import jax.numpy as jnp
from jax.experimental import pallas as pl
from jax.experimental.pallas import tpu as pltpu


# ----------------------------------------------------------------------------- kernel

def feature_att_kernel(feat_ref, cv_ref, w1_ref, b1_ref, w2_ref, b2_ref, out_ref):
    # feat_ref: (1, Cf, TP)   cv_ref: (1, Cc, D, TP)   out_ref: (1, Cc, D, TP)
    # w1: (Ch, Cf)  b1: (Ch, 1)  w2: (Cc, Ch)  b2: (Cc, 1)
    x = feat_ref[0]                                                     # (Cf, TP)
    h = jnp.dot(w1_ref[...], x, preferred_element_type=jnp.float32)     # 1x1 conv (BN folded)
    h = h + b1_ref[...]                                                 # (Ch, TP)
    h = jnp.where(h > 0, h, 0.01 * h)                                   # LeakyReLU(0.01)
    att = jnp.dot(w2_ref[...], h, preferred_element_type=jnp.float32) + b2_ref[...]
    att = jax.nn.sigmoid(att)                                           # (Cc, TP)
    # Broadcast over the (in-block) D axis; last dim is lane-dense.
    out_ref[0] = (att[:, None, :] * cv_ref[0]).astype(out_ref.dtype)


# ------------------------------------------------------------------- VMEM / tile picker

def _round_up(x, m):
    return -(-x // m) * m


def _sublane(itemsize):
    # f32 -> 8 sublanes, bf16 -> 16, int8/fp8 -> 32 (packing granularity of the
    # second-to-last block dim).
    return 8 * max(4 // max(itemsize, 1), 1)


def _vmem_capacity_bytes():
    """Physical VMEM of the attached TPU; conservative (v7x) fallback if unknown."""
    try:
        info = pltpu.get_tpu_info()
        for attr in ("vmem_capacity_bytes", "vmem_bytes", "vmem_size_bytes"):
            v = getattr(info, attr, None)
            if v:
                return int(v)
    except Exception:
        pass
    return 64 * 1024 * 1024


def _per_pixel_bytes(Cc, Cf, Ch, D, cv_itemsize, out_itemsize, feat_itemsize):
    """VMEM bytes per spatial pixel of a tile, incl. double-buffering, sublane padding
    and the in-kernel f32 temporaries (h, att)."""
    d_pad_cv = _round_up(D, _sublane(cv_itemsize))
    d_pad_out = _round_up(D, _sublane(out_itemsize))
    cf_pad = _round_up(Cf, _sublane(feat_itemsize))
    return (2 * Cc * d_pad_cv * cv_itemsize          # cv-in blocks, double buffered
            + 2 * Cc * d_pad_out * out_itemsize      # out blocks, double buffered
            + 2 * cf_pad * feat_itemsize             # feat blocks, double buffered
            + (_round_up(Ch, 8) + _round_up(Cc, 8)) * 4)   # f32 temps h, att


def _pick_tile_p(P, B, per_pixel, block_budget_bytes, min_grid_steps=4):
    """Largest lane-aligned tile_p whose blocks fit the budget; guarantees enough grid
    steps for megacore (v7x) as long as that keeps tiles >= 512 lanes."""
    cap = max(block_budget_bytes // max(per_pixel, 1), 128)
    tile = max((cap // 128) * 128, 128)

    # Megacore / overlap: prefer at least `min_grid_steps` grid steps, but never shrink
    # tiles below 512 lanes (measured HBM-roofline knee).
    if B * pl.cdiv(P, tile) < min_grid_steps:
        needed_p_tiles = pl.cdiv(min_grid_steps, B)
        candidate = _round_up(pl.cdiv(P, needed_p_tiles), 128)
        if candidate >= 512:
            tile = min(tile, candidate)

    # A tile covering the whole row uses the full array dim (always a legal block dim),
    # otherwise keep the 128-multiple tile and let Pallas mask the partial last block.
    if tile >= P:
        tile = P
    return tile


# ----------------------------------------------------------------------------- wrapper

def feature_att(cv, feat, params, *, tile_p=None, out_dtype=None, donate_cv=False):
    """cv: (B, Cc, D, H, W), feat: (B, Cf, H, W)  (torch NCDHW / NCHW layouts)."""
    B, Cc, D, H, W = cv.shape
    _, Cf, _, _ = feat.shape
    P = H * W

    w1, b1, w2, b2 = params                     # (Ch,Cf), (Ch,1), (Cc,Ch), (Cc,1)
    Ch = w1.shape[0]

    out_dtype = jnp.dtype(out_dtype) if out_dtype is not None else cv.dtype

    # --- generation-aware VMEM budgeting -------------------------------------------
    phys_vmem = _vmem_capacity_bytes()                     # 64 MiB v7x, 128 MiB v5e/v6e
    vmem_target = int(phys_vmem * 0.75)                    # 48 MiB v7x, 96 MiB v5e/v6e
    block_budget = vmem_target // 2                        # 24 MiB v7x, 48 MiB v5e/v6e

    per_pixel = _per_pixel_bytes(Cc, Cf, Ch, D,
                                 cv.dtype.itemsize, out_dtype.itemsize,
                                 feat.dtype.itemsize)

    if tile_p is None:
        tile_p = _pick_tile_p(P, B, per_pixel, block_budget)
    assert tile_p == P or tile_p % 128 == 0, \
        "tile_p must be a multiple of 128 (lane-dense) or the full spatial extent"

    # vmem_limit derived from what we actually allocate (blocks + weights + slack),
    # clamped well below the physical VMEM of this generation.
    weight_bytes = sum(int(a.size) * a.dtype.itemsize for a in (w1, b1, w2, b2)) * 2
    need = per_pixel * _round_up(tile_p, 128) + weight_bytes + (2 << 20)
    vmem_limit = min(int(phys_vmem * 0.85), max(need, 32 << 20))

    # Pure reshapes of the torch tensors: no transposes, no extra HBM copies.
    feat_f = feat.reshape(B, Cf, P)             # (B, Cf, P)
    cv_f = cv.reshape(B, Cc, D, P)              # (B, Cc, D, P)

    grid = (B, pl.cdiv(P, tile_p))              # partial trailing p-block handled by Pallas

    cost = pl.CostEstimate(
        flops=2 * B * P * (Cf * Ch + Ch * Cc) + B * Cc * D * P,
        transcendentals=B * Cc * P,                                    # sigmoid
        bytes_accessed=(cv_f.size * cv_f.dtype.itemsize
                        + cv_f.size * out_dtype.itemsize
                        + feat_f.size * feat_f.dtype.itemsize),
    )

    aliases = {}
    if donate_cv and out_dtype == cv.dtype:
        aliases = {1: 0}                        # cv_f is operand index 1

    out = pl.pallas_call(
        feature_att_kernel,
        out_shape=jax.ShapeDtypeStruct((B, Cc, D, P), out_dtype),
        grid_spec=pltpu.PrefetchScalarGridSpec(
            num_scalar_prefetch=0,
            grid=grid,
            in_specs=[
                pl.BlockSpec((1, Cf, tile_p), lambda b, p: (b, 0, p)),
                pl.BlockSpec((1, Cc, D, tile_p), lambda b, p: (b, 0, 0, p)),
                pl.BlockSpec((Ch, Cf), lambda b, p: (0, 0)),
                pl.BlockSpec((Ch, 1), lambda b, p: (0, 0)),
                pl.BlockSpec((Cc, Ch), lambda b, p: (0, 0)),
                pl.BlockSpec((Cc, 1), lambda b, p: (0, 0)),
            ],
            out_specs=pl.BlockSpec((1, Cc, D, tile_p), lambda b, p: (b, 0, 0, p)),
        ),
        compiler_params=pltpu.CompilerParams(
            dimension_semantics=("parallel", "parallel"),   # B and P-tiles shard across TCs
            vmem_limit_bytes=vmem_limit,
        ),
        cost_estimate=cost,
        input_output_aliases=aliases,
    )(feat_f, cv_f, w1, b1, w2, b2)

    # Output is already channel-major; just reshape back (free).
    return out.reshape(B, Cc, D, H, W)


# ----------------------------------------------------------------------- params & ref

def init_params(key, feat_chan, cv_chan):
    """Deterministic synthetic parameters; BatchNorm (eval mode) folded into conv1.

    Weights are kept in PyTorch (Cout, Cin) layout, which is exactly the transposed
    form the kernel wants (no in-kernel transposes)."""
    Ch = feat_chan // 2
    k1, k2, k3, k4, k5, k6 = jax.random.split(key, 6)
    w1 = 0.1 * jax.random.normal(k1, (Ch, feat_chan), jnp.float32)     # conv1 1x1, no bias
    gamma = 1.0 + 0.1 * jax.random.normal(k2, (Ch,), jnp.float32)      # BN weight
    beta = 0.1 * jax.random.normal(k3, (Ch,), jnp.float32)             # BN bias
    running_mean = 0.1 * jax.random.normal(k4, (Ch,), jnp.float32)
    running_var = jnp.abs(1.0 + 0.1 * jax.random.normal(k5, (Ch,), jnp.float32))
    eps = 1e-5
    scale = gamma / jnp.sqrt(running_var + eps)
    w1_folded = w1 * scale[:, None]                                    # (Ch, Cf)
    b1_folded = (beta - running_mean * scale)[:, None]                 # (Ch, 1)
    w2 = 0.1 * jax.random.normal(k6, (cv_chan, Ch), jnp.float32)       # conv2 1x1 (Cc, Ch)
    b2 = 0.05 * jnp.ones((cv_chan, 1), jnp.float32)                    # conv2 bias (Cc, 1)
    return w1_folded, b1_folded, w2, b2


def reference(cv, feat, params):
    """Pure-JAX reference of the same (BN-folded) forward."""
    w1, b1, w2, b2 = params
    B, Cf, H, W = feat.shape
    x = feat.reshape(B, Cf, H * W)                                     # (B, Cf, P)
    h = jnp.einsum('oc,bcp->bop', w1, x) + b1[None]                    # (B, Ch, P)
    h = jnp.where(h > 0, h, 0.01 * h)
    att = jax.nn.sigmoid(jnp.einsum('oc,bcp->bop', w2, h) + b2[None])  # (B, Cc, P)
    att = att.reshape(B, -1, 1, H, W)                                  # (B, Cc, 1, H, W)
    return att * cv


# --------------------------------------------------------------------------------- main

if __name__ == "__main__":
    key = jax.random.PRNGKey(0)
    kf, kc, kp = jax.random.split(key, 3)

    B, Cc, D, H, W = 2, 8, 4, 8, 8     # cv: (B, cv_chan, D, H, W)
    Cf = 16                            # feat_chan

    feat = jax.random.normal(kf, (B, Cf, H, W), jnp.float32)
    cv = jax.random.normal(kc, (B, Cc, D, H, W), jnp.float32)
    params = init_params(kp, Cf, Cc)

    out = jax.block_until_ready(feature_att(cv, feat, params))
    ref = reference(cv, feat, params)

    assert out.shape == cv.shape
    assert jnp.allclose(out, ref, atol=1e-5, rtol=1e-5), "mismatch vs reference"
    print("KERNEL_OK")
</pallas_src>

<mosaic_0001>
module attributes {stable_mosaic.version = 11 : i64} {
  func.func @feature_att_kernel(%arg0: i32, %arg1: i32, %arg2: memref<1x16x64xf32, #tpu.memory_space<vmem>>, %arg3: memref<1x8x4x64xf32, #tpu.memory_space<vmem>>, %arg4: memref<8x16xf32, #tpu.memory_space<vmem>>, %arg5: memref<8x1xf32, #tpu.memory_space<vmem>>, %arg6: memref<8x8xf32, #tpu.memory_space<vmem>>, %arg7: memref<8x1xf32, #tpu.memory_space<vmem>>, %arg8: memref<1x8x4x64xf32, #tpu.memory_space<vmem>>) attributes {dimension_semantics = [#tpu.dimension_semantics<parallel>, #tpu.dimension_semantics<parallel>], iteration_bounds = array<i64: 2, 1>, scalar_prefetch = 0 : i64, scratch_operands = 0 : i64, tpu.core_type = #tpu.core_type<tc>, window_params = [{transform_indices = @transform_0, window_bounds = array<i64: 1, 16, 64>}, {transform_indices = @transform_1, window_bounds = array<i64: 1, 8, 4, 64>}, {pipeline_mode = #tpu.pipeline_mode<synchronous>, transform_indices = @transform_2, window_bounds = array<i64: 8, 16>}, {pipeline_mode = #tpu.pipeline_mode<synchronous>, transform_indices = @transform_3, window_bounds = array<i64: 8, 1>}, {pipeline_mode = #tpu.pipeline_mode<synchronous>, transform_indices = @transform_4, window_bounds = array<i64: 8, 8>}, {pipeline_mode = #tpu.pipeline_mode<synchronous>, transform_indices = @transform_5, window_bounds = array<i64: 8, 1>}, {transform_indices = @transform_6, window_bounds = array<i64: 1, 8, 4, 64>}]} {
    %c0 = arith.constant 0 : index
    %c0_0 = arith.constant 0 : index
    %c0_1 = arith.constant 0 : index
    %0 = vector.load %arg2[%c0, %c0_0, %c0_1] : memref<1x16x64xf32, #tpu.memory_space<vmem>>, vector<1x16x64xf32>
    %1 = vector.shape_cast %0 : vector<1x16x64xf32> to vector<16x64xf32>
    %c0_2 = arith.constant 0 : index
    %c0_3 = arith.constant 0 : index
    %2 = vector.load %arg4[%c0_2, %c0_3] : memref<8x16xf32, #tpu.memory_space<vmem>>, vector<8x16xf32>
    %cst = arith.constant dense<0.000000e+00> : vector<8x64xf32>
    %3 = tpu.matmul %2, %1, %cst {dimension_numbers = #tpu.dot_dimension_numbers<[1], [0], [0], [1], [0, 0, 1, 1], [], []>} : vector<8x16xf32>, vector<16x64xf32>, vector<8x64xf32> -> vector<8x64xf32>
    %c0_4 = arith.constant 0 : index
    %c0_5 = arith.constant 0 : index
    %4 = vector.load %arg5[%c0_4, %c0_5] : memref<8x1xf32, #tpu.memory_space<vmem>>, vector<8x1xf32>
    %5 = vector.broadcast %4 : vector<8x1xf32> to vector<8x64xf32>
    %6 = arith.addf %3, %5 : vector<8x64xf32>
    %cst_6 = arith.constant 0.000000e+00 : f32
    %7 = vector.broadcast %cst_6 : f32 to vector<8x64xf32>
    %8 = arith.cmpf ogt, %6, %7 : vector<8x64xf32>
    %cst_7 = arith.constant 0.00999999977 : f32
    %9 = vector.broadcast %cst_7 : f32 to vector<8x64xf32>
    %10 = arith.mulf %9, %6 : vector<8x64xf32>
    %11 = arith.select %8, %6, %10 : vector<8x64xi1>, vector<8x64xf32>
    %c0_8 = arith.constant 0 : index
    %c0_9 = arith.constant 0 : index
    %12 = vector.load %arg6[%c0_8, %c0_9] : memref<8x8xf32, #tpu.memory_space<vmem>>, vector<8x8xf32>
    %cst_10 = arith.constant dense<0.000000e+00> : vector<8x64xf32>
    %13 = tpu.matmul %12, %11, %cst_10 {dimension_numbers = #tpu.dot_dimension_numbers<[1], [0], [0], [1], [0, 0, 1, 1], [], []>} : vector<8x8xf32>, vector<8x64xf32>, vector<8x64xf32> -> vector<8x64xf32>
    %c0_11 = arith.constant 0 : index
    %c0_12 = arith.constant 0 : index
    %14 = vector.load %arg7[%c0_11, %c0_12] : memref<8x1xf32, #tpu.memory_space<vmem>>, vector<8x1xf32>
    %15 = vector.broadcast %14 : vector<8x1xf32> to vector<8x64xf32>
    %16 = arith.addf %13, %15 : vector<8x64xf32>
    %17 = arith.negf %16 : vector<8x64xf32>
    %18 = math.exp %17 : vector<8x64xf32>
    %cst_13 = arith.constant 1.000000e+00 : f32
    %19 = vector.broadcast %cst_13 : f32 to vector<8x64xf32>
    %20 = arith.addf %19, %18 : vector<8x64xf32>
    %21 = arith.divf %19, %20 : vector<8x64xf32>
    %22 = vector.shape_cast %21 : vector<8x64xf32> to vector<8x1x64xf32>
    %c0_14 = arith.constant 0 : index
    %c0_15 = arith.constant 0 : index
    %c0_16 = arith.constant 0 : index
    %c0_17 = arith.constant 0 : index
    %23 = vector.load %arg3[%c0_14, %c0_15, %c0_16, %c0_17] : memref<1x8x4x64xf32, #tpu.memory_space<vmem>>, vector<1x8x4x64xf32>
    %24 = vector.shape_cast %23 : vector<1x8x4x64xf32> to vector<8x4x64xf32>
    %25 = vector.broadcast %22 : vector<8x1x64xf32> to vector<8x4x64xf32>
    %26 = arith.mulf %25, %24 : vector<8x4x64xf32>
    %c0_18 = arith.constant 0 : index
    %c0_19 = arith.constant 0 : index
    %c0_20 = arith.constant 0 : index
    %c0_21 = arith.constant 0 : index
    %27 = vector.load %arg8[%c0_18, %c0_19, %c0_20, %c0_21] : memref<1x8x4x64xf32, #tpu.memory_space<vmem>>, vector<1x8x4x64xf32>
    %28 = vector.shape_cast %27 : vector<1x8x4x64xf32> to vector<8x4x64xf32>
    %29 = vector.shape_cast %26 : vector<8x4x64xf32> to vector<1x8x4x64xf32>
    tpu.vector_store %arg8[%c0_18, %c0_19, %c0_20, %c0_21], %29 {strides = array<i32>} : memref<1x8x4x64xf32, #tpu.memory_space<vmem>>, vector<1x8x4x64xf32>,
    return
  }
  func.func @transform_0(%arg0: i32, %arg1: i32) -> (i32, i32, i32) {
    %c0_i32 = arith.constant 0 : i32
    %c0_i32_0 = arith.constant 0 : i32
    return %arg0, %c0_i32, %arg1 : i32, i32, i32
  }
  func.func @transform_1(%arg0: i32, %arg1: i32) -> (i32, i32, i32, i32) {
    %c0_i32 = arith.constant 0 : i32
    %c0_i32_0 = arith.constant 0 : i32
    %c0_i32_1 = arith.constant 0 : i32
    return %arg0, %c0_i32, %c0_i32_0, %arg1 : i32, i32, i32, i32
  }
  func.func @transform_2(%arg0: i32, %arg1: i32) -> (i32, i32) {
    %c0_i32 = arith.constant 0 : i32
    %c0_i32_0 = arith.constant 0 : i32
    %c0_i32_1 = arith.constant 0 : i32
    return %c0_i32, %c0_i32_0 : i32, i32
  }
  func.func @transform_3(%arg0: i32, %arg1: i32) -> (i32, i32) {
    %c0_i32 = arith.constant 0 : i32
    %c0_i32_0 = arith.constant 0 : i32
    %c0_i32_1 = arith.constant 0 : i32
    return %c0_i32, %c0_i32_0 : i32, i32
  }
  func.func @transform_4(%arg0: i32, %arg1: i32) -> (i32, i32) {
    %c0_i32 = arith.constant 0 : i32
    %c0_i32_0 = arith.constant 0 : i32
    %c0_i32_1 = arith.constant 0 : i32
    return %c0_i32, %c0_i32_0 : i32, i32
  }
  func.func @transform_5(%arg0: i32, %arg1: i32) -> (i32, i32) {
    %c0_i32 = arith.constant 0 : i32
    %c0_i32_0 = arith.constant 0 : i32
    %c0_i32_1 = arith.constant 0 : i32
    return %c0_i32, %c0_i32_0 : i32, i32
  }
  func.func @transform_6(%arg0: i32, %arg1: i32) -> (i32, i32, i32, i32) {
    %c0_i32 = arith.constant 0 : i32
    %c0_i32_0 = arith.constant 0 : i32
    %c0_i32_1 = arith.constant 0 : i32
    return %arg0, %c0_i32, %c0_i32_0, %arg1 : i32, i32, i32, i32
  }
}

</mosaic_0001>

<bundles_post_ra>
// kernel: tpu_custom_call.1
= control target key start
LH: loop header
LB: loop body
LE: loop exit
PB: predicated region body
PF: predicated region fallthrough
CT: control target
= control target key end

     0   :  { %s1327_s0 = inlined_call_operand.hbm [shape: f32[2,16,64], index: 0, kind: input, shape index: {}]   ;;  %s1328_s1 = inlined_call_operand.hbm [shape: f32[2,8,4,64], index: 1, kind: input, shape index: {}]   ;;  %s1329_s2 = inlined_call_operand.vmem [shape: f32[8,16], index: 2, kind: input, shape index: {}]   ;;  %s1330_s3 = inlined_call_operand.vmem [shape: f32[8,1], index: 3, kind: input, shape index: {}]   ;;  %s1331_s4 = inlined_call_operand.vmem [shape: f32[8,8], index: 4, kind: input, shape index: {}]   ;;  %s1332_s5 = inlined_call_operand.vmem [shape: f32[8,1], index: 5, kind: input, shape index: {}]   ;;  %s1333_s6 = inlined_call_operand.hbm [shape: f32[2,8,4,64], index: 6, kind: output, shape index: {}]  }
   0x1   :  { %1337 = sst [smem:[#allocation12_spill]] %s1327_s0 }
   0x2   :  { %11 = vsyncpa [#allocation3], 0 }
   0x3   :  { %13 = vsyncpa [#allocation3 + $0x1], 0 }
   0x4   :  { %14 = vsyncpa [#allocation6], 0 }
   0x5   :  { %16 = vsyncpa [#allocation6 + $0x1], 0 }
   0x6   :  { %17 = vsyncpa [#allocation4], 0 }
   0x7   :  { %19 = vsyncpa [#allocation4 + $0x1], 0  ;;  %s1068_s21 = smov 0   ;;  %s1070_s22 = smov 0  }
   0x8   :  { %s1072_s23 = smov 0   ;;  %s1074_s24 = smov 0  }
   0x9   :  { %s1076_s25 = smov 0   ;;  %s1078_s26 = smov 0  }
   0xa LB: > { %s743_s27 = sadd.s32 4294967295, %s1017_s26   ;;  %s744_s28 = sadd.s32 4294967294, %s1017_s26   ;;  %s1017_s26 = sphi %s1078_s26, %s25_s26   ;;  %s1013_s25 = sphi %s1076_s25, %s1356_s25   ;;  %s1009_s24 = sphi %s1074_s24, %s1355_s24   ;;  %s1005_s23 = sphi %s1072_s23, %s1354_s23   ;;  %s1001_s22 = sphi %s1070_s22, %s1353_s22   ;;  %s997_s21 = sphi %s1068_s21, %s1352_s21  }
   0xb   : > { %s37_s29 = sadd.s32 1, %s1013_s25  ;;  %s46_s30 = sadd.s32 1, %s1005_s23 }
   0xc   : > { %p39_p0 = scmp.ge.s32.totalorder %s37_s29, 2  ;;  %p53_p1 = scmp.ne.s32.totalorder %s1005_s23, %s1001_s22 }
   0xd   : > { %p54_p2 = scmp.eq.s32.totalorder %s1017_s26, 0  ;;  %p59_p3 = scmp.ne.s32.totalorder %s1001_s22, %s997_s21 }
   0xe   : > { %s1358_s29 = smov (%p39_p0, %s37_s29), 0  ;;  %p60_p5 = scmp.eq.s32.totalorder %s743_s27, 0 }
   0xf   : > { %1338 = sst [smem:[#allocation11_spill]] %s1358_s29  ;;  %p1109_p4 = por %p54_p2, %p53_p1 }
  0x10   : > { %s41_s8 = ssub.s32 %s1013_s25, %s1358_s29  ;;  %p197_p6 = scmp.eq.s32.totalorder %s743_s27, 1 }
  0x11   : > { %p44_p7 = scmp.eq.s32.totalorder %s41_s8, 0  ;;  %p1115_p8 = por %p60_p5, %p59_p3 }
  0x12   : > { %p1119_p9 = por %p197_p6, %p53_p1  ;;  %p203_p10 = scmp.eq.s32.totalorder %s744_s28, 1 }
  0x13   : > { %s1340_s9 = scalar_select %p1115_p8, 1, 0 }
  0x14   : > { %s1341_s10 = scalar_select %p1119_p9, 1, 0 }
  0x15   : > { %s1124_s11 = scalar_select %p44_p7, %s1005_s23, %s46_s30  }
  0x16   : > { %p1126_p11 = por %p203_p10, %p59_p3  ;;  %p805_p13 = scmp.lt.s32.totalorder %s1017_s26, 2 }
  0x17   : > { %s1133_s13 = sand.u32 1, %s1005_s23   ;;  %s765_s15 = sshll.u32 %s1013_s25, 8 }
  0x18   : > { %s1342_s12 = scalar_select %p1126_p11, 1, 0 }
  0x19   : > { %s747_s14 = sshll.u32 %s1133_s13, 4  ;;  %s1343_s0 = sld [smem:[#allocation12_spill]] }
  0x1a   : > { %s239_s19 = scalar_lea.vmem [#allocation2], %s747_s14  ;;  %p1146_p0 = pnand %p805_p13, %p1109_p4 }
  0x1b   : > { %s247_s20 = sshll.u32 %s239_s19, 4  ;;  %s236_s28 = scalar_lea.sflag [#allocation3], %s1133_s13  ;;  %s1142_s20 = int_to_ptr.vmem [resolvable:$true] %s247_s20 }
  0x1c   : > { %p873_p3 = pneg %p1146_p0 }
  0x1f   : > { %s1140_s18 = scalar_lea.hbm %s1343_s0, %s765_s15  ;;  %s876_s7 = scalar_lea.hbm %s1343_s0, 512 }
  0x20   : > { %s871_s30 = scalar_lea.hbm %s1140_s18, 256  ;;  %p877_p4 = scmp.lt.u32.totalorder %s1140_s18, %s1343_s0 }
  0x21   : > { %p872_p2 = scmp.ne.s32.totalorder %s1140_s18, %s871_s30  ;;  %p878_p7 = scmp.lt.u32.totalorder %s876_s7, %s871_s30 }
  0x22   : > { %p880_p13 = scmp.lt.u32.totalorder %s871_s30, %s1140_s18 }
  0x23   : > { %p874_p5 = pnand %p873_p3, %p872_p2  ;;  %p879_p10 = por %p878_p7, %p877_p4 }
  0x25   : > { %p875_p6 = pneg %p874_p5  ;;  %p881_p12 = por %p880_p13, %p879_p10 }
  0x27   : > { %p882_p1 = pnand %p881_p12, %p875_p6 }
  0x29   : > { %885 = shalt.err (!%p882_p1)
}
  0x2a   : > { %s886_s17 = scalar_lea.vmem %s1142_s20, 256  ;;  %s1019_s19 = smov [#allocation2]  }
  0x2b   : > { %p887_p2 = scmp.ne.s32.totalorder %s1142_s20, %s886_s17  ;;  %s891_s8 = sshll.u32 %s1019_s19, 4  ;;  %s892_s8 = int_to_ptr.vmem [resolvable:$false] %s891_s8 }
  0x2c   : > { %s893_s14 = scalar_lea.vmem %s892_s8, 512  ;;  %p894_p9 = scmp.lt.s32.totalorder %s1142_s20, %s892_s8 }
  0x2d   : > { %p889_p5 = pnand %p887_p2, %p873_p3  ;;  %p895_p4 = scmp.lt.s32.totalorder %s893_s14, %s886_s17 }
  0x2f   : > { %p890_p11 = pneg %p889_p5  ;;  %p896_p7 = por %p895_p4, %p894_p9 }
  0x31   : > { %p897_p10 = pnand %p896_p7, %p890_p11 }
  0x33   : > { %900 = shalt.err (!%p897_p10)
}
  0x34   : > { %s1020_s30 = smov 128   ;;  %s1021_s7 = smov 8  }
  0x35   : > { %797 = dma.hbm_to_vmem [thread:$0]  (!%p1146_p0), %s1140_s18, 256, %s1142_s20, %s236_s28, %s1020_s30, %s1020_s30, %s1021_s7  }
  0x36   : > { %p277_p12 = scmp.lt.s32.totalorder %s1017_s26, 3  ;;  %s750_s15 = sshll.u32 %s1133_s13, 5 }
  0x37   : > { %s766_s16 = sshll.u32 %s1013_s25, 9  ;;  %p1345_p9 = scmp.ge.s32.totalorder %s1017_s26, 1 }
  0x38   : > { %s1191_s14 = scalar_lea.hbm %s1328_s1, %s766_s16  ;;  %s261_s0 = scalar_lea.vmem [#allocation5], %s750_s15 }
  0x39   : > { %p1184_p11 = pnand %p1345_p9, %p277_p12  ;;  %s269_s29 = sshll.u32 %s261_s0, 4  ;;  %s1193_s29 = int_to_ptr.vmem [resolvable:$true] %s269_s29 }
  0x3a   : > { %s258_s18 = scalar_lea.sflag [#allocation6], %s1133_s13  ;;  %s901_s20 = scalar_lea.hbm %s1191_s14, 512 }
  0x3b   : > { %p902_p1 = scmp.ne.s32.totalorder %s1191_s14, %s901_s20  ;;  %s906_s7 = scalar_lea.hbm %s1328_s1, 1024 }
  0x3c   : > { %p907_p2 = scmp.lt.u32.totalorder %s1191_s14, %s1328_s1  ;;  %p908_p5 = scmp.lt.u32.totalorder %s906_s7, %s901_s20 }
  0x3d   : > { %p904_p6 = pnand %p902_p1, %p873_p3  ;;  %p910_p7 = scmp.lt.u32.totalorder %s901_s20, %s1191_s14 }
  0x3e   : > { %p909_p4 = por %p908_p5, %p907_p2 }
  0x3f   : > { %p905_p13 = pneg %p904_p6 }
  0x40   : > { %p911_p10 = por %p910_p7, %p909_p4 }
  0x42   : > { %p912_p12 = pnand %p911_p10, %p905_p13 }
  0x44   : > { %915 = shalt.err (!%p912_p12)
}
  0x45   : > { %s916_s0 = scalar_lea.vmem %s1193_s29, 512  ;;  %s1022_s15 = smov [#allocation5]  }
  0x46   : > { %p917_p9 = scmp.ne.s32.totalorder %s1193_s29, %s916_s0  ;;  %s921_s8 = sshll.u32 %s1022_s15, 4  ;;  %s922_s8 = int_to_ptr.vmem [resolvable:$false] %s921_s8 }
  0x47   : > { %s923_s28 = scalar_lea.vmem %s922_s8, 1024  ;;  %p924_p8 = scmp.lt.s32.totalorder %s1193_s29, %s922_s8 }
  0x48   : > { %p919_p1 = pnand %p917_p9, %p873_p3  ;;  %p925_p2 = scmp.lt.s32.totalorder %s923_s28, %s916_s0 }
  0x4a   : > { %p920_p6 = pneg %p919_p1  ;;  %p926_p5 = por %p925_p2, %p924_p8 }
  0x4c   : > { %p927_p4 = pnand %p926_p5, %p920_p6 }
  0x4e   : > { %930 = shalt.err (!%p927_p4)
}
  0x4f   : > { %s1023_s20 = smov 64   ;;  %s1024_s30 = smov 4  }
  0x50   : > { %800 = dma.hbm_to_vmem [thread:$0]  (!%p1146_p0), %s1191_s14, 512, %s1193_s29, %s258_s18, %s1023_s20, %s1023_s20, %s1024_s30  }
  0x51   : > { %281 = sbr.rel (%p1184_p11) target bundleno = 586 (0x24a), region = 44  ;;  %s1224_s7 = sand.u32 (!%p1184_p11), 1, %s1001_s22  }
  0x52   : > { %s754_s16 = sshll.u32 (!%p1184_p11), %s1224_s7, 4  ;;  %s284_s19 = scalar_lea.sflag (!%p1184_p11), [#allocation3], %s1224_s7 }
  0x53   : > { %s287_s0 = scalar_lea.vmem (!%p1184_p11), [#allocation2], %s754_s16  ;;  %p1347_p8 = scmp.ne.s32.totalorder (!%p1184_p11), %s1340_s9, 0 }
  0x58   : > { %984 = dma.done.wait (%p1347_p8), %s284_s19, 256  }
  0x59   : > { %986 = vsyncadd (%p1347_p8), %s284_s19, 4294967040  ;;  %s755_s29 = sshll.u32 %s1224_s7, 5  ;;  %s293_s13 = scalar_lea.sflag [#allocation6], %s1224_s7 }
  0x5a   : > { %s1236_s27 = scalar_lea.vmem [#allocation5], %s755_s29 }
  0x5b   : > { %988 = dma.done.wait (%p1347_p8), %s293_s13, 512  }
  0x5c   : > { %990 = vsyncadd (%p1347_p8), %s293_s13, 4294966784  ;;  %v1025_v0 = vmov 0.0|0.0   ;;  %vm1026_vm0 = vmmov 0   ;;  %v1027_v1 = vmov 0.0   ;;  %v1028_v2 = vmov 0   ;;  %v330_v3 = vld [vmem:[%s287_s0] sm:$0xff] }
  0x5d   : > { %785 = vmatprep.subr.bf16.mxu0 %v1025_v0  ;;  %777 = vmatprep.mubr.msk.f32.mxu0 %vm1026_vm0, %v1027_v1  ;;  %v331_v4 = vld [vmem:[%s287_s0 + $0x8] sm:$0xff]  ;;  %v333_v6 = vld [vmem:[%s1330_s3] sm:$0xff]  ;;  %vm339_vm1 = vcmask 130048   ;;  %vm423_vm3 = vcmask 64512   ;;  %v1029_v23 = vmov 1966171168   ;;  %v508_v25 = vlaneseq }
  0x5e   : > { %866 = vset.pattern.permute.xlu0 %v1028_v2  ;;  %780 = vmatprep.subr.mxu1 %v1027_v1  ;;  %v786_v5 = vpack.c.bf16 %v331_v4, %v330_v3  ;;  %v332_v7 = vld [vmem:[%s1329_s2] sm:$0xff]  ;;  %v506_v24 = vunpack.c.l.s4 %v1029_v23  ;;  %vm609_vm4 = vcmask 519168   ;;  %v555_v46 = vld [vmem:[%s1236_s27 + $0x8] sm:$0xf]  ;;  %v557_v47 = vld [vmem:[%s1236_s27 + $0x10] sm:$0xf] }
  0x5f   : > { %782 = vmatprep.mubr.msk.f32.mxu1 %vm1026_vm0, %v1027_v1  ;;  %336 = vperm.xlu0 %866, %v333_v6   ;;  %v417_v8 = vld [vmem:[%s1332_s5] sm:$0xff]  ;;  %v509_v27 = vshrl.u32 %v508_v25, 7  ;;  %v556_v49 = vld [vmem:[%s1236_s27 + $0xc] sm:$0xf]  ;;  %v558_v50 = vld [vmem:[%s1236_s27 + $0x14] sm:$0xf] }
  0x60   : > { %787 = vmatpush3.bf16.msra.mxu0 %v786_v5  ;;  %v416_v14 = vld [vmem:[%s1331_s4] sm:$0xff]  ;;  %v507_v26 = vunpack.c.0.s8 %v506_v24  ;;  %v559_v51 = vld [vmem:[%s1236_s27 + $0x18] sm:$0xf]  ;;  %s767_s30 = sshll.u32 %s1009_s24, 9  ;;  %s329_s16 = scalar_lea.vmem [#allocation7], %s755_s29 }
  0x61   : > { %v563_v32 = vsub.s32 0, %v509_v27  ;;  %v553_v40 = vld [vmem:[%s1236_s27] sm:$0xf]  ;;  %v554_v45 = vld [vmem:[%s1236_s27 + $0x4] sm:$0xf]  ;;  %s633_s19 = sshll.u32 %s329_s16, 4  ;;  %s1272_s29 = scalar_lea.hbm %s1333_s6, %s767_s30  ;;  %s1274_s19 = int_to_ptr.vmem [resolvable:$true] %s633_s19 }
  0x62   : > { %v510_v28 = vsub.s32 %v507_v26, %v509_v27  ;;  %v560_v59 = vld [vmem:[%s1236_s27 + $0x1c] sm:$0xf]  ;;  %s619_s13 = scalar_lea.sflag [#allocation4], %s1224_s7  ;;  %s931_s27 = scalar_lea.vmem %s1274_s19, 512 }
  0x63   : > { %778 = vmatmul.mubr.msk.f32.vlgmr.msra.gmra.mrb[0].mxu0 %vm339_vm1, %v332_v7  ;;  %420 = vperm.xlu0 %866, %v417_v8   ;;  %p932_p0 = scmp.ne.s32.totalorder %s1274_s19, %s931_s27  ;;  %p1348_p3 = scmp.ne.s32.totalorder %s1341_s10, 0 }
  0x64   : > { %s1030_s17 = smov [#allocation7]  }
  0x65   : > { %p933_p11 = pnand %p932_p0, %p1348_p3  ;;  %s935_s14 = sshll.u32 %s1030_s17, 4  ;;  %s936_s14 = int_to_ptr.vmem [resolvable:$false] %s935_s14 }
  0x66   : > { %s937_s9 = scalar_lea.vmem %s936_s14, 1024  ;;  %p938_p7 = scmp.lt.s32.totalorder %s1274_s19, %s936_s14 }
  0x67   : > { %p934_p13 = pneg %p933_p11  ;;  %p939_p10 = scmp.lt.s32.totalorder %s937_s9, %s931_s27 }
  0x69   : > { %p940_p12 = por %p939_p10, %p938_p7 }
  0x6b   : > { %p941_p9 = pnand %p940_p12, %p934_p13 }
  0xde   : > { %v337_v9 = vpop.permute.xlu0 %336 }
  0xe2   : > { %v421_v16 = vpop.permute.xlu0 %420 }
 0x136   : > { %v409_v10 = vpop.f32.mrb[0].mxu0 }
 0x137   : > { %v410_v11 = vadd.f32 %v409_v10, %v337_v9  ;;  %v779_v12 = vpop.f32.mrb[1].mxu0 }
 0x139   : > { %vm413_vm2 = vcmp.gt.f32.partialorder %v410_v11, 0.0  ;;  %v414_v13 = vmul.f32 0.01, %v410_v11 }
 0x13b   : > { %v415_v15 = vsel %vm413_vm2, %v410_v11, %v414_v13 }
 0x13c   : > { %781 = vmatpush3.msra.mxu1 %v415_v15 }
 0x13d   : > { %783 = vmatmul.mubr.msk.f32.vlgmr.msra.gmra.mrb[0].mxu1 %vm423_vm3, %v416_v14 }
 0x210   : > { %v493_v17 = vpop.f32.mrb[0].mxu1 }
 0x211   : > { %v494_v18 = vadd.f32 %v493_v17, %v421_v16  ;;  %v784_v19 = vpop.f32.mrb[1].mxu1 }
 0x213   : > { %v759_v20 = vmul.f32 -1.442695, %v494_v18 }
 0x215   : > { %867 = vpow2.f32 %v759_v20 }
 0x21f   : > { %v868_v21 = vpop.eup %867 }
 0x220   : > { %v500_v22 = vadd.f32 1.0, %v868_v21 }
 0x222   : > { %869 = vrcp.f32 %v500_v22 }
 0x22c   : > { %v870_v29 = vpop.eup %869 }
 0x22d   : > { %v504_v30 = vcombine.high %v870_v29, %v870_v29  ;;  %v511_v31 = vrot.slane %v870_v29, %v510_v28 }
 0x22f   : > { %v518_v33 = vrot.slane %v504_v30, %v510_v28  ;;  %v519_v34 = vcombine.high %v511_v31, %v511_v31  ;;  %v527_v35 = vrot.slane %v511_v31, %v510_v28 }
 0x231   : > { %v520_v36 = vcombine.high %v518_v33, %v518_v33  ;;  %v534_v37 = vrot.slane %v518_v33, %v510_v28  ;;  %v541_v38 = vrot.slane %v519_v34, %v510_v28  ;;  %v549_v39 = vcombine.high %v527_v35, %v527_v35 }
 0x232   : > { %v564_v41 = vrot.slane %v527_v35, %v563_v32 }
 0x233   : > { %v548_v42 = vrot.slane %v520_v36, %v510_v28  ;;  %v550_v43 = vcombine.high %v534_v37, %v534_v37  ;;  %v551_v44 = vcombine.high %v541_v38, %v541_v38  ;;  %v568_v48 = vrot.slane %v541_v38, %v563_v32 }
 0x234   : > { %v572_v52 = vrot.slane %v549_v39, %v563_v32  ;;  %v580_v53 = vrot.slane %v534_v37, %v563_v32  ;;  %v601_v54 = vmul.f32 %v564_v41, %v553_v40 }
 0x235   : > { %v552_v55 = vcombine.high %v548_v42, %v548_v42  ;;  %v576_v56 = vrot.slane %v551_v44, %v563_v32  ;;  %v584_v57 = vrot.slane %v548_v42, %v563_v32  ;;  %v588_v58 = vrot.slane %v550_v43, %v563_v32 }
 0x236   : > { %v602_v60 = vmul.f32 %v568_v48, %v554_v45  ;;  %v603_v61 = vmul.f32 %v572_v52, %v555_v46  ;;  %v605_v62 = vmul.f32 %v580_v53, %v557_v47  ;;  %610 = vst.msk [vmem:[%s329_s16] sm:$0xf] %vm609_vm4, %v601_v54 }
 0x237   : > { %v592_v63 = vrot.slane %v552_v55, %v563_v32  ;;  %v604_v0 = vmul.f32 %v576_v56, %v556_v49  ;;  %v606_v1 = vmul.f32 %v584_v57, %v558_v50  ;;  %v607_v2 = vmul.f32 %v588_v58, %v559_v51 }
 0x238   : > { %611 = vst.msk [vmem:[%s329_s16 + $0x4] sm:$0xf] %vm609_vm4, %v602_v60  ;;  %612 = vst.msk [vmem:[%s329_s16 + $0x8] sm:$0xf] %vm609_vm4, %v603_v61 }
 0x239   : > { %614 = vst.msk [vmem:[%s329_s16 + $0x10] sm:$0xf] %vm609_vm4, %v605_v62  ;;  %v608_v3 = vmul.f32 %v592_v63, %v560_v59  ;;  %613 = vst.msk [vmem:[%s329_s16 + $0xc] sm:$0xf] %vm609_vm4, %v604_v0 }
 0x23a   : > { %615 = vst.msk [vmem:[%s329_s16 + $0x14] sm:$0xf] %vm609_vm4, %v606_v1  ;;  %616 = vst.msk [vmem:[%s329_s16 + $0x18] sm:$0xf] %vm609_vm4, %v607_v2 }
 0x23b   : > { %617 = vst.msk [vmem:[%s329_s16 + $0x1c] sm:$0xf] %vm609_vm4, %v608_v3 }
 0x23c   : > { %944 = shalt.err (!%p941_p9)
}
 0x23d   : > { %s945_s18 = scalar_lea.hbm %s1272_s29, 512  ;;  %s949_s28 = scalar_lea.hbm %s1333_s6, 1024 }
 0x23e   : > { %p946_p1 = scmp.ne.s32.totalorder %s1272_s29, %s945_s18  ;;  %p950_p5 = scmp.lt.u32.totalorder %s1272_s29, %s1333_s6 }
 0x23f   : > { %p951_p4 = scmp.lt.u32.totalorder %s949_s28, %s945_s18  ;;  %p953_p0 = scmp.lt.u32.totalorder %s945_s18, %s1272_s29 }
 0x240   : > { %p947_p6 = pnand %p946_p1, %p1348_p3 }
 0x241   : > { %p952_p8 = por %p951_p4, %p950_p5 }
 0x242   : > { %p948_p2 = pneg %p947_p6 }
 0x243   : > { %p954_p11 = por %p953_p0, %p952_p8 }
 0x245   : > { %p955_p13 = pnand %p954_p11, %p948_p2 }
 0x247   : > { %958 = shalt.err (!%p955_p13)
}
 0x248   : > { %s1031_s16 = smov 64   ;;  %s1032_s24 = smov 4  }
 0x249   : > { %792 = dma.vmem_to_hbm [thread:$0]  (%p1348_p3), %s1274_s19, 512, %s1272_s29, %s619_s13, %s1031_s16, %s1031_s16, %s1032_s24  }
 0x24a PF: > { %s648_s0 = sand.u32 1, %s997_s21   ;;  %p1349_p7 = scmp.ne.s32.totalorder %s1342_s12, 0 }
 0x24b   : > { %p1350_p10 = scmp.ge.s32.totalorder %s1017_s26, 2  ;;  %s649_s27 = scalar_lea.sflag [#allocation4], %s648_s0 }
 0x24d   : > { %p802_p12 = pnand %p1350_p10, %p1349_p7 }
 0x24f   : > { %992 = dma.done.wait (!%p802_p12), %s649_s27, 512  }
 0x250   : > { %994 = vsyncadd (!%p802_p12), %s649_s27, 4294966784  ;;  %s25_s26 = sadd.s32 1, %s1017_s26   ;;  %s1351_s10 = sld [smem:[#allocation11_spill]] }
 0x251   : > { %p22_p9 = scmp.ge.s32.totalorder %s25_s26, 4   ;;  %s1352_s21 = smov %s1001_s22 }
 0x252   : > { %s1353_s22 = smov %s1005_s23  ;;  %s1354_s23 = smov %s1124_s11 }
 0x253   : > { %s1355_s24 = smov %s1013_s25  ;;  %24 = sbr.rel (!%p22_p9) target bundleno = 10 (0xa), region = 102 }
 0x256   : > { %s1356_s25 = smov %s1351_s10 }
 0x25a   :  { %654 = vsyncpa [#allocation3], 1 }
 0x25b   :  { %656 = vsyncpa [#allocation3 + $0x1], 1 }
 0x25c   :  { %657 = vsyncpa [#allocation6], 1 }
 0x25d   :  { %659 = vsyncpa [#allocation6 + $0x1], 1 }
 0x25e   :  { %660 = vsyncpa [#allocation4], 1 }
 0x25f   :  { %662 = vsyncpa [#allocation4 + $0x1], 1 }

</bundles_post_ra>
